<compile_context>
chip_gen: v5e
topology: v5e:2x2
jax: 0.10.0
libtpu: 0.0.40
codegen_flags: <defaults>
</compile_context>

<pallas_src>
import jax
import jax.numpy as jnp
from jax.experimental import pallas as pl
from jax.experimental.pallas import tpu as pltpu

_LANES = 128                       # vreg lane width (keep last dim lane-dense)
_SMALL_BYTES = 512 * 1024          # below this: single full-array block
_BLOCK_BYTES = 2 * 1024 * 1024     # per-buffer tile target (x4 buffers = 8 MiB)
_DMA_CHUNK_TARGET_BYTES = 8 * 1024 * 1024
_MAX_DMA_CHUNKS = 4


# ----------------------------------------------------------------------------
# Hot path: Identity is a pure pass-through — no kernel, no bytes.
# ----------------------------------------------------------------------------
def identity_forward(x: jax.Array) -> jax.Array:
    """Identity.forward(x) == x (no kernel launch, no memory traffic)."""
    return x


def identity_inverse(x: jax.Array):
    """Identity.inverse(x) -> (x, logdet=0); logdet is a trace-time constant."""
    return x, jnp.zeros((), dtype=x.dtype)


# ----------------------------------------------------------------------------
# Materialized copy, primary path: direct HBM -> HBM DMA (zero VMEM).
# ----------------------------------------------------------------------------
def _choose_chunks(lead: int, total_bytes: int):
    """Static (start, size) chunks along the leading axis for the DMA copy."""
    if lead < 2 or total_bytes < 2 * _DMA_CHUNK_TARGET_BYTES:
        return ((0, lead),)
    n_chunks = int(min(_MAX_DMA_CHUNKS, lead,
                       max(2, total_bytes // _DMA_CHUNK_TARGET_BYTES)))
    base, rem = divmod(lead, n_chunks)
    bounds, start = [], 0
    for i in range(n_chunks):
        size = base + (1 if i < rem else 0)
        bounds.append((start, size))
        start += size
    return tuple(bounds)


def _make_dma_copy_kernel(chunk_bounds):
    single = len(chunk_bounds) == 1

    def kernel(x_hbm, o_hbm, sem):
        copies = []
        for idx, (start, size) in enumerate(chunk_bounds):
            if single:
                src, dst = x_hbm, o_hbm
            else:
                src = x_hbm.at[pl.ds(start, size)]
                dst = o_hbm.at[pl.ds(start, size)]
            cp = pltpu.make_async_copy(src, dst, sem.at[idx])
            cp.start()
            copies.append(cp)
        for cp in copies:
            cp.wait()

    return kernel


def identity_copy_pallas(x: jax.Array) -> jax.Array:
    """Materialized identity copy via direct HBM->HBM DMA.

    Only needed when a fresh output buffer must exist; the semantic hot path
    is `identity_forward`. Works for any shape/dtype with no padding, no
    reshuffle, and no VMEM footprint.
    """
    orig_shape = x.shape
    if x.ndim == 0:
        x = x.reshape(1)
    lead = x.shape[0]
    total_bytes = x.size * x.dtype.itemsize
    chunk_bounds = _choose_chunks(lead, total_bytes)
    ce = pl.CostEstimate(flops=0, transcendentals=0,
                         bytes_accessed=2 * total_bytes)

    out = pl.pallas_call(
        _make_dma_copy_kernel(chunk_bounds),
        out_shape=jax.ShapeDtypeStruct(x.shape, x.dtype),
        in_specs=[pl.BlockSpec(memory_space=pl.ANY)],
        out_specs=pl.BlockSpec(memory_space=pl.ANY),
        scratch_shapes=[pltpu.SemaphoreType.DMA((len(chunk_bounds),))],
        cost_estimate=ce,
    )(x)
    return out.reshape(orig_shape)


# ----------------------------------------------------------------------------
# Materialized copy, alternative path: tiled VMEM streaming (lane-dense).
# ----------------------------------------------------------------------------
def _copy_kernel(x_ref, o_ref):
    o_ref[...] = x_ref[...]


def _sublane_align(dtype) -> int:
    # 8 rows/vreg at 32-bit; sub-32-bit dtypes pack 2x / 4x rows per sublane.
    itemsize = dtype.itemsize
    return 8 * max(1, 4 // itemsize)


def identity_copy_tiled(x: jax.Array) -> jax.Array:
    """Materialized copy streamed through VMEM with large lane-dense blocks."""
    n = x.size
    itemsize = x.dtype.itemsize
    total_bytes = n * itemsize
    ce = pl.CostEstimate(flops=0, transcendentals=0,
                         bytes_accessed=2 * total_bytes)

    # Small-input guard: a single full-array block (exempt from the (8,128)
    # divisibility rule). No padding, no reshape, one grid step.
    if total_bytes <= _SMALL_BYTES:
        return pl.pallas_call(
            _copy_kernel,
            out_shape=jax.ShapeDtypeStruct(x.shape, x.dtype),
            cost_estimate=ce,
        )(x)

    # Lane-dense fast path: (rows, 128) reshape is a pure view when
    # n % 128 == 0 — no jnp.pad, no trailing slice.
    if n % _LANES == 0:
        rows = n // _LANES
        sub = _sublane_align(x.dtype)
        if rows % sub == 0:
            max_rows = max(sub, (_BLOCK_BYTES // (_LANES * itemsize)) // sub * sub)
            # Keep >= 2 grid steps so v7x's two TensorCores both get work.
            target = min(max_rows, max(sub, (rows // 2) // sub * sub))
            block_rows = target
            while rows % block_rows != 0:
                block_rows -= sub
            grid = (rows // block_rows,)

            x2d = x.reshape(rows, _LANES)
            out2d = pl.pallas_call(
                _copy_kernel,
                out_shape=jax.ShapeDtypeStruct((rows, _LANES), x.dtype),
                grid=grid,
                in_specs=[pl.BlockSpec((block_rows, _LANES), lambda i: (i, 0))],
                out_specs=pl.BlockSpec((block_rows, _LANES), lambda i: (i, 0)),
                compiler_params=pltpu.CompilerParams(
                    dimension_semantics=("parallel",)),
                cost_estimate=ce,
            )(x2d)
            return out2d.reshape(x.shape)

    # Ragged sizes: no padding round-trip — use the direct DMA copy instead.
    return identity_copy_pallas(x)


if __name__ == "__main__":
    # hparams: channels=4, batch_size=2.
    # MultivariateNormal(zeros, scale_tril=I).sample((B,)) == standard normal
    # draw of shape (batch_size, channels).
    hparams = {"channels": 4, "batch_size": 2}

    key = jax.random.PRNGKey(0)
    x = jax.random.normal(
        key, (hparams["batch_size"], hparams["channels"]), dtype=jnp.float32
    )

    # Hot path: pure pass-through (no kernel).
    y = jax.block_until_ready(identity_forward(x))

    # Materialized copy, primary path: HBM->HBM DMA kernel.
    y_dma = jax.block_until_ready(identity_copy_pallas(x))

    # Tiled VMEM path: small-input guard on the module input, and the
    # large lane-dense grid path (2 blocks of (2048,128)) on a bigger slab.
    y_small = jax.block_until_ready(identity_copy_tiled(x))
    big = jax.random.normal(jax.random.PRNGKey(1), (2048, 256), dtype=jnp.float32)
    big_copy = jax.block_until_ready(identity_copy_tiled(big))

    inv, logdet = identity_inverse(x)
    inv = jax.block_until_ready(inv)
    logdet = jax.block_until_ready(logdet)

    assert y.shape == x.shape and y.dtype == x.dtype
    assert bool(jnp.all(y == x))
    assert y_dma.shape == x.shape and y_dma.dtype == x.dtype
    assert bool(jnp.all(y_dma == x))
    assert y_small.shape == x.shape and bool(jnp.all(y_small == x))
    assert big_copy.shape == big.shape and bool(jnp.all(big_copy == big))
    assert bool(jnp.all(inv == x))
    assert float(logdet) == 0.0

    print("KERNEL_OK")
</pallas_src>

<mosaic_0001>
module attributes {stable_mosaic.version = 11 : i64} {
  func.func @kernel(%arg0: memref<2x4xf32, #tpu.memory_space<any>>, %arg1: memref<2x4xf32, #tpu.memory_space<any>>, %arg2: memref<1x!tpu.dma_semaphore, #tpu.memory_space<semaphore_mem>>) attributes {dimension_semantics = [], scalar_prefetch = 0 : i64, scratch_operands = 1 : i64, tpu.core_type = #tpu.core_type<tc>} {
    %c0_i32 = arith.constant 0 : i32
    %0 = tpu.memref_slice %arg2[%c0_i32] : memref<1x!tpu.dma_semaphore, #tpu.memory_space<semaphore_mem>> -> memref<1x!tpu.dma_semaphore, #tpu.memory_space<semaphore_mem>>
    %1 = tpu.memref_squeeze %0 : memref<1x!tpu.dma_semaphore, #tpu.memory_space<semaphore_mem>> -> memref<!tpu.dma_semaphore, #tpu.memory_space<semaphore_mem>>
    tpu.enqueue_dma source(%arg0 : memref<2x4xf32, #tpu.memory_space<any>>) target(%arg1 : memref<2x4xf32, #tpu.memory_space<any>>) target_semaphore(%1 : memref<!tpu.dma_semaphore, #tpu.memory_space<semaphore_mem>>)
    %c0_i32_0 = arith.constant 0 : i32
    %2 = tpu.memref_slice %arg2[%c0_i32_0] : memref<1x!tpu.dma_semaphore, #tpu.memory_space<semaphore_mem>> -> memref<1x!tpu.dma_semaphore, #tpu.memory_space<semaphore_mem>>
    %3 = tpu.memref_squeeze %2 : memref<1x!tpu.dma_semaphore, #tpu.memory_space<semaphore_mem>> -> memref<!tpu.dma_semaphore, #tpu.memory_space<semaphore_mem>>
    tpu.wait_dma2 semaphore(%3 : memref<!tpu.dma_semaphore, #tpu.memory_space<semaphore_mem>>) src(%arg0 : memref<2x4xf32, #tpu.memory_space<any>>) dst(%arg1 : memref<2x4xf32, #tpu.memory_space<any>>)
    return
  }
}

</mosaic_0001>

<bundles_post_ra>
// kernel: tpu_custom_call.1
= control target key start
LH: loop header
LB: loop body
LE: loop exit
PB: predicated region body
PF: predicated region fallthrough
CT: control target
= control target key end

     0   :  { %s32_s12 = smov [#allocation2]   ;;  %s33_s13 = smov [#allocation3]   ;;  %s51_s0 = inlined_call_operand.hbm [shape: f32[2,4], index: 0, kind: input, shape index: {}]   ;;  %s52_s1 = inlined_call_operand.hbm [shape: f32[2,4], index: 1, kind: output, shape index: {}]  }
   0x1   :  { %s10_s8 = sshll.u32 %s51_s0, 4  ;;  %s12_s11 = sshll.u32 %s52_s1, 4  ;;  %s11_s8 = int_to_ptr.hbm [resolvable:$true] %s10_s8  ;;  %s13_s11 = int_to_ptr.hbm [resolvable:$true] %s12_s11 }
   0x2   :  { %s34_s14 = smov 0  }
   0x3   :  { %16 = dma.general %s11_s8, 32, %s13_s11, %s32_s12, %s33_s13, [#allocation4], %s34_s14, 0  }
   0x4   :  { %30 = dma.done.wait [#allocation2], 32 }
   0x5   :  { %31 = vsyncadd [#allocation2], 4294967264 }
   0x6   :  { %20 = vsyncmov [#allocation2] }
   0x9   :  { %s21_s15 = vpop.sfrf %20 }
   0xa   :  { %p26_p0 = scmp.ne.s32.totalorder %s21_s15, 0 }
   0xc   :  { %25 = shalt.err (%p26_p0)  }

</bundles_post_ra>
